<compile_context>
chip_gen: v5e
topology: v5e:2x2
jax: 0.10.0
libtpu: 0.0.40
codegen_flags: <defaults>
</compile_context>

<pallas_src>
import functools

import jax
import jax.numpy as jnp
from jax import lax
from jax.experimental import pallas as pl
from jax.experimental.pallas import tpu as pltpu


def _round_up(x, m):
    return ((x + m - 1) // m) * m


# -----------------------------------------------------------------------------
# Shared online-softmax step + finalize over a streamed E tile
# -----------------------------------------------------------------------------
def _softmax_step_and_finalize(q, e_ref, o_ref, m_sc, l_sc, acc_sc, *, n_pad_cols):
    k = pl.program_id(1)
    e = e_ref[...]
    # scores (M_TILE, V_TILE): contraction on the last dim of both operands,
    # no transpose / relayout of the E tile.
    scores = lax.dot_general(
        q, e, dimension_numbers=(((1,), (1,)), ((), ())),
        preferred_element_type=jnp.float32)

    m_prev = m_sc[...]
    m_new = jnp.maximum(m_prev, jnp.max(scores, axis=-1, keepdims=True))
    alpha = jnp.exp(m_prev - m_new)
    p_tile = jnp.exp(scores - m_new)
    l_sc[...] = alpha * l_sc[...] + jnp.sum(p_tile, axis=-1, keepdims=True)
    # Reuse the same E tile for the mixture matmul (E read from HBM once
    # per (M tile, V tile)).
    acc_sc[...] = alpha * acc_sc[...] + jnp.dot(
        p_tile.astype(e.dtype), e, preferred_element_type=jnp.float32)
    m_sc[...] = m_new

    @pl.when(k == pl.num_programs(1) - 1)
    def _finalize():
        l = l_sc[...]
        if n_pad_cols:  # static: padded E rows are zero -> they contribute
            # exp(0 - m_final) each to the denominator (and nothing to acc,
            # since the corresponding E rows are zero). Subtract exactly.
            l = l - float(n_pad_cols) * jnp.exp(-m_sc[...])
        inv_l = pl.reciprocal(l, approx=False)
        o_ref[...] = (acc_sc[...] * inv_l).astype(o_ref.dtype)


# -----------------------------------------------------------------------------
# Kernel variant A: projection fused in-kernel (W resident in VMEM)
# -----------------------------------------------------------------------------
def _mapping_kernel_fused(x_ref, w_ref, e_ref, o_ref,
                          q_sc, m_sc, l_sc, acc_sc,
                          *, inv_hidden, n_pad_cols):
    @pl.when(pl.program_id(1) == 0)
    def _init():
        # q = (x @ W^T) * (1/H), once per M tile; contraction on the last dim
        # of both operands (no transposed W copy anywhere). Store q in E's
        # dtype so the steady-state V loop has no per-step recast.
        q = lax.dot_general(
            x_ref[...], w_ref[...],
            dimension_numbers=(((1,), (1,)), ((), ())),
            preferred_element_type=jnp.float32)
        q_sc[...] = (q * inv_hidden).astype(q_sc.dtype)
        m_sc[...] = jnp.full(m_sc.shape, -jnp.inf, m_sc.dtype)
        l_sc[...] = jnp.zeros(l_sc.shape, l_sc.dtype)
        acc_sc[...] = jnp.zeros(acc_sc.shape, acc_sc.dtype)

    _softmax_step_and_finalize(q_sc[...], e_ref, o_ref, m_sc, l_sc, acc_sc,
                               n_pad_cols=n_pad_cols)


# -----------------------------------------------------------------------------
# Kernel variant B: projection hoisted to XLA; q = (x @ W^T)/H is an input
# (used when the resident (H,H) W would blow the VMEM budget, e.g. v7x, H>=2K)
# -----------------------------------------------------------------------------
def _mapping_kernel_hoisted(q_ref, e_ref, o_ref, m_sc, l_sc, acc_sc,
                            *, n_pad_cols):
    @pl.when(pl.program_id(1) == 0)
    def _init():
        m_sc[...] = jnp.full(m_sc.shape, -jnp.inf, m_sc.dtype)
        l_sc[...] = jnp.zeros(l_sc.shape, l_sc.dtype)
        acc_sc[...] = jnp.zeros(acc_sc.shape, acc_sc.dtype)

    _softmax_step_and_finalize(q_ref[...], e_ref, o_ref, m_sc, l_sc, acc_sc,
                               n_pad_cols=n_pad_cols)


def prompt_mapping(prompt_embeds, cross_attn_weight, word_embeddings, *,
                   m_tile=None, v_tile=None, compute_dtype=None,
                   hoist_projection=None, e_buffer_count=2):
    """prompt_embeds: (B, L, H); cross_attn_weight: torch-style (H_out, H_in);
    word_embeddings: (V, H).  Returns (B, L, H) = softmax((x@W^T)@E^T / H) @ E."""
    B, L, H = prompt_embeds.shape
    V = word_embeddings.shape[0]
    out_dtype = prompt_embeds.dtype

    if compute_dtype is None:
        # Keep native numerics by default; pass jnp.bfloat16 to halve the
        # dominant E HBM stream / MXU passes when accuracy allows.
        compute_dtype = jnp.result_type(prompt_embeds.dtype, word_embeddings.dtype)
    c_itemsize = jnp.dtype(compute_dtype).itemsize
    out_itemsize = jnp.dtype(out_dtype).itemsize

    # Fold batch into the M axis so the MXU sees full tiles.
    M = B * L
    x = prompt_embeds.reshape(M, H).astype(compute_dtype)
    w = cross_attn_weight.astype(compute_dtype)   # (out, in); never transposed
    e = word_embeddings.astype(compute_dtype)

    # Hoist the projection out of the kernel when a VMEM-resident W would be
    # expensive (critical on v7x's 64 MiB VMEM; e.g. H >= ~2K in bf16).
    if hoist_projection is None:
        hoist_projection = (2 * H * H * c_itemsize) > (8 << 20)

    # ---- tile selection ------------------------------------------------------
    # m_tile: arithmetic intensity on the streamed E is ~2*m_tile flop/byte, so
    # default up to 512 (compute-bound on v6e/v7x HBM ridges) while keeping
    # >= 2 M tiles when possible so both v7x TensorCores are fed via the
    # "parallel" M axis.  (On v5e 256 is already past the ridge; 512 only
    # costs VMEM — still safe with the budget check below.)
    if m_tile is None:
        m_all = _round_up(M, 8)
        if m_all <= 256:
            m_tile = m_all
        elif m_all <= 1024:
            m_tile = min(512, _round_up((m_all + 1) // 2, 256))
        else:
            m_tile = 512
    # v_tile: lane/MXU-aligned (multiple of 256, prefer >= 512), budgeted so
    # the multi-buffered E stream stays around ~8 MiB.
    if v_tile is None:
        if V <= 1024:
            v_tile = _round_up(V, 8)
        else:
            bufs = max(2, e_buffer_count)
            v_fit = (8 << 20) // max(1, bufs * H * c_itemsize)
            v_tile = max(512, (v_fit // 256) * 256)
            v_tile = min(v_tile, _round_up(V, 512))

    # ---- VMEM working-set accounting (incl. (m_tile, v_tile) temporaries) ---
    def _vmem_estimate(mt, vt):
        inter = (8 + 2 * c_itemsize) * mt * vt              # scores/exp f32 + p cast
        small = 4 * mt * 128 * 4                            # (mt,1) f32 stats, lane-padded
        e_buf = max(2, e_buffer_count) * vt * H * c_itemsize
        o_buf = 2 * mt * H * out_itemsize
        acc = mt * H * 4
        if hoist_projection:
            base = 2 * mt * H * c_itemsize                  # q input double buffer
        else:
            base = (2 * mt * H * c_itemsize                 # x double buffer
                    + 2 * H * H * c_itemsize                # resident W
                    + mt * H * c_itemsize)                  # q scratch
        return inter + small + e_buf + o_buf + acc + base

    budget = 40 << 20   # headroom under v7x's 64 MiB physical VMEM
    while _vmem_estimate(m_tile, v_tile) > budget:
        if V > 1024 and v_tile > 512:
            v_tile = max(512, ((v_tile // 2) // 256) * 256)
        elif m_tile > 256 and M > 256:
            m_tile = max(256, _round_up(m_tile // 2, 128))
        else:
            break

    m_pad = _round_up(M, m_tile)
    v_pad = _round_up(V, v_tile)
    n_pad_cols = v_pad - V

    if m_pad != M:
        x = jnp.pad(x, ((0, m_pad - M), (0, 0)))
    if v_pad != V:
        e = jnp.pad(e, ((0, v_pad - V), (0, 0)))   # zero rows; denominator fixed in-kernel

    if hoist_projection:
        q = lax.dot_general(x, w, dimension_numbers=(((1,), (1,)), ((), ())),
                            preferred_element_type=jnp.float32)
        q = (q * (1.0 / float(H))).astype(compute_dtype)

    grid = (m_pad // m_tile, v_pad // v_tile)

    e_spec_kwargs = {}
    if e_buffer_count != 2:
        # Deeper buffering of the E stream (v6e, if DMA still partially exposed).
        e_spec_kwargs["pipeline_mode"] = pl.Buffered(e_buffer_count)
    e_spec = pl.BlockSpec((v_tile, H), lambda m, v: (v, 0), **e_spec_kwargs)
    row_in_spec = pl.BlockSpec((m_tile, H), lambda m, v: (m, 0))
    row_out_spec = pl.BlockSpec((m_tile, H), lambda m, v: (m, 0))

    est = _vmem_estimate(m_tile, v_tile)
    vmem_limit = int(min(max(est + est // 4 + (2 << 20), 24 << 20), 48 << 20))

    # HBM traffic: E is streamed once per M tile (not once in total).
    bytes_accessed = (grid[0] * v_pad * H * c_itemsize
                      + m_pad * H * (c_itemsize + out_itemsize)
                      + (0 if hoist_projection else H * H * c_itemsize))
    flops = 4 * M * V * H + (0 if hoist_projection else 2 * M * H * H)
    cost = pl.CostEstimate(flops=int(flops), transcendentals=int(M * v_pad),
                           bytes_accessed=int(bytes_accessed))

    common = dict(
        out_shape=jax.ShapeDtypeStruct((m_pad, H), out_dtype),
        grid=grid,
        out_specs=row_out_spec,
        compiler_params=pltpu.CompilerParams(
            dimension_semantics=("parallel", "arbitrary"),
            vmem_limit_bytes=vmem_limit),
        cost_estimate=cost,
    )

    if hoist_projection:
        kernel = functools.partial(_mapping_kernel_hoisted, n_pad_cols=n_pad_cols)
        out = pl.pallas_call(
            kernel,
            in_specs=[row_in_spec, e_spec],
            scratch_shapes=[
                pltpu.VMEM((m_tile, 1), jnp.float32),   # running max
                pltpu.VMEM((m_tile, 1), jnp.float32),   # running denom
                pltpu.VMEM((m_tile, H), jnp.float32),   # output accumulator
            ],
            **common,
        )(q, e)
    else:
        kernel = functools.partial(_mapping_kernel_fused,
                                   inv_hidden=1.0 / float(H),
                                   n_pad_cols=n_pad_cols)
        out = pl.pallas_call(
            kernel,
            in_specs=[
                row_in_spec,                                  # prompt rows (resident over V)
                pl.BlockSpec((H, H), lambda m, v: (0, 0)),    # cross_attn weight (resident)
                e_spec,                                       # streamed E tile
            ],
            scratch_shapes=[
                pltpu.VMEM((m_tile, H), compute_dtype),  # q in E's dtype: no per-step cast
                pltpu.VMEM((m_tile, 1), jnp.float32),    # running max
                pltpu.VMEM((m_tile, 1), jnp.float32),    # running denom
                pltpu.VMEM((m_tile, H), jnp.float32),    # output accumulator
            ],
            **common,
        )(x, w, e)

    return out[:M].reshape(B, L, H)


# -----------------------------------------------------------------------------
# KGPrompt forward (output_entity=False branch)
# -----------------------------------------------------------------------------
def kg_prompt_forward(params, token_embeds, context_input_embeddings,
                      attention_mask, *, n_examples, prompt_max_length,
                      hidden_size, mapping=True, m_tile=None, v_tile=None,
                      compute_dtype=None, hoist_projection=None):
    # batch_size: torch code takes it from entity_ids; the subsequent .view()
    # only succeeds when it equals token_embeds.shape[0] // n_examples.
    batch_size = token_embeds.shape[0] // n_examples

    prompt_embeds = token_embeds[:, :prompt_max_length, :]
    prompt_embeds = prompt_embeds.reshape(
        batch_size, n_examples * prompt_max_length, hidden_size)

    if mapping:
        prompt_embeds = prompt_mapping(
            prompt_embeds, params["cross_attn_weight"], params["word_embeddings"],
            m_tile=m_tile, v_tile=v_tile, compute_dtype=compute_dtype,
            hoist_projection=hoist_projection)

    L = n_examples * prompt_max_length
    prompt_attention_mask = jnp.ones((prompt_embeds.shape[0], L),
                                     dtype=attention_mask.dtype)
    context_input_embeddings = jnp.concatenate(
        [prompt_embeds, context_input_embeddings], axis=1)
    attention_mask = jnp.concatenate(
        [prompt_attention_mask, attention_mask], axis=1)

    retrieved_vector = None
    retrieved_entity_embeds = None
    return context_input_embeddings, attention_mask, retrieved_vector, retrieved_entity_embeds


# -----------------------------------------------------------------------------
# Pure-JAX reference (for correctness check)
# -----------------------------------------------------------------------------
def _reference_mapping(prompt_embeds, cross_attn_weight, word_embeddings, hidden_size):
    q = jnp.einsum("blh,oh->blo", prompt_embeds, cross_attn_weight)
    scores = jnp.einsum("blh,vh->blv", q, word_embeddings) / hidden_size
    probs = jax.nn.softmax(scores, axis=-1)
    return jnp.einsum("blv,vh->blh", probs, word_embeddings)


if __name__ == "__main__":
    # Small shapes consistent with the module's forward.
    batch_size = 2
    n_examples = 3
    prompt_max_length = 8
    hidden_size = 32          # n_head=2 -> head_dim=16 (unused in this branch)
    vocab_size = 128
    seq_len = 12              # token_embeds seq length (>= prompt_max_length)
    ctx_len = 8               # context sequence length

    key = jax.random.PRNGKey(0)
    k0, k1, k2, k3, k4 = jax.random.split(key, 5)

    # Only the parameters used by this forward branch (output_entity=False,
    # entity_ids=None): node_embeds, entity_proj*, token_proj*, prompt_proj*,
    # prefix embeds are untouched and omitted.
    params = {
        # nn.Linear(hidden, hidden, bias=False): weight shape (out, in)
        "cross_attn_weight": jax.random.normal(
            k0, (hidden_size, hidden_size), jnp.float32) * 0.05,
        "word_embeddings": jax.random.normal(
            k1, (vocab_size, hidden_size), jnp.float32) * 0.1,
    }

    token_embeds = jax.random.normal(
        k2, (batch_size * n_examples, seq_len, hidden_size), jnp.float32)
    context_input_embeddings = jax.random.normal(
        k3, (batch_size, ctx_len, hidden_size), jnp.float32)
    attention_mask = (jax.random.uniform(k4, (batch_size, ctx_len)) > 0.2
                      ).astype(jnp.float32)

    # --- Test 1: explicit tiles, multi-tile + padding, fused projection -------
    # M=48 -> m_tile=32 (pad to 64), V=128 -> v_tile=48 (pad to 144, corrected).
    ctx_out, mask_out, rvec, rembeds = kg_prompt_forward(
        params, token_embeds, context_input_embeddings, attention_mask,
        n_examples=n_examples, prompt_max_length=prompt_max_length,
        hidden_size=hidden_size, mapping=True, m_tile=32, v_tile=48)
    jax.block_until_ready(ctx_out)
    jax.block_until_ready(mask_out)

    L = n_examples * prompt_max_length
    prompt_ref = token_embeds[:, :prompt_max_length, :].reshape(
        batch_size, L, hidden_size)
    mapped_ref = _reference_mapping(
        prompt_ref, params["cross_attn_weight"], params["word_embeddings"],
        hidden_size)
    ctx_ref = jnp.concatenate([mapped_ref, context_input_embeddings], axis=1)
    mask_ref = jnp.concatenate(
        [jnp.ones((batch_size, L), attention_mask.dtype), attention_mask], axis=1)

    assert ctx_out.shape == (batch_size, L + ctx_len, hidden_size)
    assert mask_out.shape == (batch_size, L + ctx_len)
    assert jnp.allclose(ctx_out, ctx_ref, atol=2e-4, rtol=2e-4), (
        float(jnp.max(jnp.abs(ctx_out - ctx_ref))))
    assert jnp.allclose(mask_out, mask_ref)
    assert rvec is None and rembeds is None

    # --- Test 2: default auto-tiled (single-tile) fused path -------------------
    mapped_auto = prompt_mapping(
        prompt_ref, params["cross_attn_weight"], params["word_embeddings"])
    jax.block_until_ready(mapped_auto)
    assert jnp.allclose(mapped_auto, mapped_ref, atol=2e-4, rtol=2e-4)

    # --- Test 3: hoisted-projection path (as used for large H on v7x) ---------
    mapped_hoist = prompt_mapping(
        prompt_ref, params["cross_attn_weight"], params["word_embeddings"],
        m_tile=32, v_tile=48, hoist_projection=True)
    jax.block_until_ready(mapped_hoist)
    assert jnp.allclose(mapped_hoist, mapped_ref, atol=2e-4, rtol=2e-4)

    # --- Test 4: bf16 compute dtype smoke test (loose tolerance) --------------
    mapped_bf16 = prompt_mapping(
        prompt_ref, params["cross_attn_weight"], params["word_embeddings"],
        compute_dtype=jnp.bfloat16)
    jax.block_until_ready(mapped_bf16)
    assert jnp.allclose(mapped_bf16, mapped_ref, atol=1e-2, rtol=5e-2)

    print("KERNEL_OK")
</pallas_src>

<mosaic_0001>
module attributes {stable_mosaic.version = 11 : i64} {
  func.func @_mapping_kernel_fused(%arg0: i32, %arg1: i32, %arg2: memref<32x32xf32, #tpu.memory_space<vmem>>, %arg3: memref<32x32xf32, #tpu.memory_space<vmem>>, %arg4: memref<48x32xf32, #tpu.memory_space<vmem>>, %arg5: memref<32x32xf32, #tpu.memory_space<vmem>>, %arg6: memref<32x32xf32, #tpu.memory_space<vmem>>, %arg7: memref<32x1xf32, #tpu.memory_space<vmem>>, %arg8: memref<32x1xf32, #tpu.memory_space<vmem>>, %arg9: memref<32x32xf32, #tpu.memory_space<vmem>>) attributes {dimension_semantics = [#tpu.dimension_semantics<parallel>, #tpu.dimension_semantics<arbitrary>], iteration_bounds = array<i64: 2, 3>, scalar_prefetch = 0 : i64, scratch_operands = 4 : i64, tpu.core_type = #tpu.core_type<tc>, window_params = [{transform_indices = @transform_0, window_bounds = array<i64: 32, 32>}, {pipeline_mode = #tpu.pipeline_mode<synchronous>, transform_indices = @transform_1, window_bounds = array<i64: 32, 32>}, {transform_indices = @transform_2, window_bounds = array<i64: 48, 32>}, {transform_indices = @transform_3, window_bounds = array<i64: 32, 32>}]} {
    %c0_i32 = arith.constant 0 : i32
    %0 = arith.cmpi eq, %arg1, %c0_i32 : i32
    %1 = arith.extui %0 : i1 to i32
    %c0_i32_0 = arith.constant 0 : i32
    %2 = arith.cmpi ne, %1, %c0_i32_0 : i32
    scf.if %2 {
      %c0_20 = arith.constant 0 : index
      %c0_21 = arith.constant 0 : index
      %31 = vector.load %arg2[%c0_20, %c0_21] : memref<32x32xf32, #tpu.memory_space<vmem>>, vector<32x32xf32>
      %c0_22 = arith.constant 0 : index
      %c0_23 = arith.constant 0 : index
      %32 = vector.load %arg3[%c0_22, %c0_23] : memref<32x32xf32, #tpu.memory_space<vmem>>, vector<32x32xf32>
      %cst_24 = arith.constant dense<0.000000e+00> : vector<32x32xf32>
      %33 = tpu.matmul %31, %32, %cst_24 {dimension_numbers = #tpu.dot_dimension_numbers<[1], [1], [0], [0], [0, 0, 1, 0], [], []>} : vector<32x32xf32>, vector<32x32xf32>, vector<32x32xf32> -> vector<32x32xf32>
      %cst_25 = arith.constant 3.125000e-02 : f32
      %34 = vector.broadcast %cst_25 : f32 to vector<32x32xf32>
      %35 = arith.mulf %33, %34 : vector<32x32xf32>
      %c0_26 = arith.constant 0 : index
      %c0_27 = arith.constant 0 : index
      %36 = vector.load %arg6[%c0_26, %c0_27] : memref<32x32xf32, #tpu.memory_space<vmem>>, vector<32x32xf32>
      tpu.vector_store %arg6[%c0_26, %c0_27], %35 {strides = array<i32>} : memref<32x32xf32, #tpu.memory_space<vmem>>, vector<32x32xf32>,
      %cst_28 = arith.constant 0xFF800000 : f32
      %37 = vector.broadcast %cst_28 : f32 to vector<32x1xf32>
      %c0_29 = arith.constant 0 : index
      %c0_30 = arith.constant 0 : index
      %38 = vector.load %arg7[%c0_29, %c0_30] : memref<32x1xf32, #tpu.memory_space<vmem>>, vector<32x1xf32>
      tpu.vector_store %arg7[%c0_29, %c0_30], %37 {strides = array<i32>} : memref<32x1xf32, #tpu.memory_space<vmem>>, vector<32x1xf32>,
      %cst_31 = arith.constant 0.000000e+00 : f32
      %39 = vector.broadcast %cst_31 : f32 to vector<32x1xf32>
      %c0_32 = arith.constant 0 : index
      %c0_33 = arith.constant 0 : index
      %40 = vector.load %arg8[%c0_32, %c0_33] : memref<32x1xf32, #tpu.memory_space<vmem>>, vector<32x1xf32>
      tpu.vector_store %arg8[%c0_32, %c0_33], %39 {strides = array<i32>} : memref<32x1xf32, #tpu.memory_space<vmem>>, vector<32x1xf32>,
      %cst_34 = arith.constant 0.000000e+00 : f32
      %41 = vector.broadcast %cst_34 : f32 to vector<32x32xf32>
      %c0_35 = arith.constant 0 : index
      %c0_36 = arith.constant 0 : index
      %42 = vector.load %arg9[%c0_35, %c0_36] : memref<32x32xf32, #tpu.memory_space<vmem>>, vector<32x32xf32>
      tpu.vector_store %arg9[%c0_35, %c0_36], %41 {strides = array<i32>} : memref<32x32xf32, #tpu.memory_space<vmem>>, vector<32x32xf32>,
    } else {
    }
    %c0 = arith.constant 0 : index
    %c0_1 = arith.constant 0 : index
    %3 = vector.load %arg6[%c0, %c0_1] : memref<32x32xf32, #tpu.memory_space<vmem>>, vector<32x32xf32>
    %c0_2 = arith.constant 0 : index
    %c0_3 = arith.constant 0 : index
    %4 = vector.load %arg4[%c0_2, %c0_3] : memref<48x32xf32, #tpu.memory_space<vmem>>, vector<48x32xf32>
    %cst = arith.constant dense<0.000000e+00> : vector<32x48xf32>
    %5 = tpu.matmul %3, %4, %cst {dimension_numbers = #tpu.dot_dimension_numbers<[1], [1], [0], [0], [0, 0, 1, 0], [], []>} : vector<32x32xf32>, vector<48x32xf32>, vector<32x48xf32> -> vector<32x48xf32>
    %c0_4 = arith.constant 0 : index
    %c0_5 = arith.constant 0 : index
    %6 = vector.load %arg7[%c0_4, %c0_5] : memref<32x1xf32, #tpu.memory_space<vmem>>, vector<32x1xf32>
    %cst_6 = arith.constant dense<0xFF800000> : vector<32xf32>
    %7 = vector.multi_reduction <maximumf>, %5, %cst_6 [1] : vector<32x48xf32> to vector<32xf32>
    %8 = vector.shape_cast %7 : vector<32xf32> to vector<32x1xf32>
    %9 = arith.maximumf %6, %8 : vector<32x1xf32>
    %10 = arith.subf %6, %9 : vector<32x1xf32>
    %11 = math.exp %10 : vector<32x1xf32>
    %12 = vector.broadcast %9 : vector<32x1xf32> to vector<32x48xf32>
    %13 = arith.subf %5, %12 : vector<32x48xf32>
    %14 = math.exp %13 : vector<32x48xf32>
    %c0_7 = arith.constant 0 : index
    %c0_8 = arith.constant 0 : index
    %15 = vector.load %arg8[%c0_7, %c0_8] : memref<32x1xf32, #tpu.memory_space<vmem>>, vector<32x1xf32>
    %16 = arith.mulf %11, %15 : vector<32x1xf32>
    %cst_9 = arith.constant dense<0.000000e+00> : vector<32xf32>
    %17 = vector.multi_reduction <add>, %14, %cst_9 [1] : vector<32x48xf32> to vector<32xf32>
    %18 = vector.shape_cast %17 : vector<32xf32> to vector<32x1xf32>
    %19 = arith.addf %16, %18 : vector<32x1xf32>
    %c0_10 = arith.constant 0 : index
    %c0_11 = arith.constant 0 : index
    %20 = vector.load %arg8[%c0_10, %c0_11] : memref<32x1xf32, #tpu.memory_space<vmem>>, vector<32x1xf32>
    tpu.vector_store %arg8[%c0_10, %c0_11], %19 {strides = array<i32>} : memref<32x1xf32, #tpu.memory_space<vmem>>, vector<32x1xf32>,
    %c0_12 = arith.constant 0 : index
    %c0_13 = arith.constant 0 : index
    %21 = vector.load %arg9[%c0_12, %c0_13] : memref<32x32xf32, #tpu.memory_space<vmem>>, vector<32x32xf32>
    %22 = vector.broadcast %11 : vector<32x1xf32> to vector<32x32xf32>
    %23 = arith.mulf %22, %21 : vector<32x32xf32>
    %cst_14 = arith.constant dense<0.000000e+00> : vector<32x32xf32>
    %24 = tpu.matmul %14, %4, %cst_14 {dimension_numbers = #tpu.dot_dimension_numbers<[1], [0], [0], [1], [0, 0, 1, 1], [], []>} : vector<32x48xf32>, vector<48x32xf32>, vector<32x32xf32> -> vector<32x32xf32>
    %25 = arith.addf %23, %24 : vector<32x32xf32>
    %c0_15 = arith.constant 0 : index
    %c0_16 = arith.constant 0 : index
    %26 = vector.load %arg9[%c0_15, %c0_16] : memref<32x32xf32, #tpu.memory_space<vmem>>, vector<32x32xf32>
    tpu.vector_store %arg9[%c0_15, %c0_16], %25 {strides = array<i32>} : memref<32x32xf32, #tpu.memory_space<vmem>>, vector<32x32xf32>,
    %c0_17 = arith.constant 0 : index
    %c0_18 = arith.constant 0 : index
    %27 = vector.load %arg7[%c0_17, %c0_18] : memref<32x1xf32, #tpu.memory_space<vmem>>, vector<32x1xf32>
    tpu.vector_store %arg7[%c0_17, %c0_18], %9 {strides = array<i32>} : memref<32x1xf32, #tpu.memory_space<vmem>>, vector<32x1xf32>,
    %c2_i32 = arith.constant 2 : i32
    %28 = arith.cmpi eq, %arg1, %c2_i32 : i32
    %29 = arith.extui %28 : i1 to i32
    %c0_i32_19 = arith.constant 0 : i32
    %30 = arith.cmpi ne, %29, %c0_i32_19 : i32
    scf.if %30 {
      %c0_20 = arith.constant 0 : index
      %c0_21 = arith.constant 0 : index
      %31 = vector.load %arg8[%c0_20, %c0_21] : memref<32x1xf32, #tpu.memory_space<vmem>>, vector<32x1xf32>
      %c0_22 = arith.constant 0 : index
      %c0_23 = arith.constant 0 : index
      %32 = vector.load %arg7[%c0_22, %c0_23] : memref<32x1xf32, #tpu.memory_space<vmem>>, vector<32x1xf32>
      %cst_24 = arith.constant 0.000000e+00 : f32
      %33 = vector.broadcast %cst_24 : f32 to vector<32x1xf32>
      %34 = arith.subf %33, %32 : vector<32x1xf32>
      %35 = math.exp %34 : vector<32x1xf32>
      %cst_25 = arith.constant 1.600000e+01 : f32
      %36 = vector.broadcast %cst_25 : f32 to vector<32x1xf32>
      %37 = arith.mulf %36, %35 : vector<32x1xf32>
      %38 = arith.subf %31, %37 : vector<32x1xf32>
      %39 = tpu.reciprocal %38 : vector<32x1xf32> -> vector<32x1xf32>
      %c0_26 = arith.constant 0 : index
      %c0_27 = arith.constant 0 : index
      %40 = vector.load %arg9[%c0_26, %c0_27] : memref<32x32xf32, #tpu.memory_space<vmem>>, vector<32x32xf32>
      %41 = vector.broadcast %39 : vector<32x1xf32> to vector<32x32xf32>
      %42 = arith.mulf %40, %41 : vector<32x32xf32>
      %c0_28 = arith.constant 0 : index
      %c0_29 = arith.constant 0 : index
      %43 = vector.load %arg5[%c0_28, %c0_29] : memref<32x32xf32, #tpu.memory_space<vmem>>, vector<32x32xf32>
      tpu.vector_store %arg5[%c0_28, %c0_29], %42 {strides = array<i32>} : memref<32x32xf32, #tpu.memory_space<vmem>>, vector<32x32xf32>,
    } else {
    }
    return
  }
  func.func @transform_0(%arg0: i32, %arg1: i32) -> (i32, i32) {
    %c0_i32 = arith.constant 0 : i32
    %c0_i32_0 = arith.constant 0 : i32
    return %arg0, %c0_i32 : i32, i32
  }
  func.func @transform_1(%arg0: i32, %arg1: i32) -> (i32, i32) {
    %c0_i32 = arith.constant 0 : i32
    %c0_i32_0 = arith.constant 0 : i32
    %c0_i32_1 = arith.constant 0 : i32
    return %c0_i32, %c0_i32_0 : i32, i32
  }
  func.func @transform_2(%arg0: i32, %arg1: i32) -> (i32, i32) {
    %c0_i32 = arith.constant 0 : i32
    %c0_i32_0 = arith.constant 0 : i32
    return %arg1, %c0_i32 : i32, i32
  }
  func.func @transform_3(%arg0: i32, %arg1: i32) -> (i32, i32) {
    %c0_i32 = arith.constant 0 : i32
    %c0_i32_0 = arith.constant 0 : i32
    return %arg0, %c0_i32 : i32, i32
  }
}

</mosaic_0001>

<bundles_post_ra>
// kernel: tpu_custom_call.1
= control target key start
LH: loop header
LB: loop body
LE: loop exit
PB: predicated region body
PF: predicated region fallthrough
CT: control target
= control target key end

     0   :  { %s945_s12 = smov 0   ;;  %s947_s13 = smov 0   ;;  %s1169_s0 = inlined_call_operand.vmem [shape: f32[64,32], index: 0, kind: input, shape index: {}]   ;;  %s1170_s1 = inlined_call_operand.vmem [shape: f32[32,32], index: 1, kind: input, shape index: {}]   ;;  %s1171_s2 = inlined_call_operand.vmem [shape: f32[144,32], index: 2, kind: input, shape index: {}]   ;;  %s1172_s3 = inlined_call_operand.vmem [shape: f32[64,32], index: 3, kind: output, shape index: {}]  }
   0x1   :  { %s949_s14 = smov 0   ;;  %s951_s15 = smov 0  }
   0x2   :  { %s953_s16 = smov 0  }
   0x3 LB: > { %s22_s17 = sadd.s32 1, %s911_s14  ;;  %s25_s18 = sadd.s32 1, %s915_s15  ;;  %s919_s16 = sphi %s953_s16, %s13_s16   ;;  %s915_s15 = sphi %s951_s15, %s1186_s15   ;;  %s911_s14 = sphi %s949_s14, %s1185_s14   ;;  %s907_s13 = sphi %s947_s13, %s1184_s13   ;;  %s903_s12 = sphi %s945_s12, %s1183_s12  }
   0x4   : > { %p23_p0 = scmp.ge.s32.totalorder %s22_s17, 3  ;;  %p744_p1 = scmp.ge.s32.totalorder %s919_s16, 1 }
   0x5   : > { %p161_p2 = scmp.lt.s32.totalorder %s919_s16, 7 }
   0x6   : > { %s1188_s17 = smov (%p23_p0, %s22_s17), 0  ;;  %s1190_s18 = smov (!%p23_p0, %s25_s18), %s915_s15 }
   0x7   : > { %p162_p3 = pnand %p744_p1, %p161_p2  ;;  %p27_p4 = scmp.ge.s32.totalorder %s1190_s18, 2 }
   0x8   : > { %s745_s19 = sshll.u32 (!%p162_p3), %s907_s13, 2  ;;  %s196_s20 = smul.u32 (!%p162_p3), 6, %s903_s12 }
   0x9   : > { %s1192_s18 = smov (%p27_p4, %s1190_s18), 0  ;;  %165 = sbr.rel (%p162_p3) target bundleno = 872 (0x368), region = 32 }
   0xa   : > { %p191_p5 = scmp.lt.s32.totalorder (!%p162_p3), %s745_s19, 7  ;;  %p197_p6 = scmp.lt.s32.totalorder (!%p162_p3), %s196_s20, 17 }
   0xb   : > { %p750_p7 = scmp.ne.s32.totalorder (!%p162_p3), %s903_s12, 0 }
   0xe   : > { %s1194_s19 = smov (!%p191_p5, %s745_s19), 7  ;;  %s1196_s20 = smov (!%p197_p6, %s196_s20), 17 }
   0xf   : > { %s746_s21 = sshll.u32 %s1194_s19, 3  ;;  %s747_s25 = sshll.u32 %s1196_s20, 3 }
  0x10   : > { %s981_s24 = scalar_lea.vmem %s1169_s0, %s746_s21  ;;  %s986_s28 = scalar_lea.vmem %s1171_s2, %s747_s25 }
  0x11   : > { %s991_s4 = scalar_lea.vmem %s1172_s3, %s746_s21  ;;  %211 = sbr.rel (%p750_p7) target bundleno = 174 (0xae), region = 36 }
  0x16   : > { %v219_v0 = vld [vmem:[%s1170_s1 + $0x18] sm:$0xff]  ;;  %vm220_vm0 = vcmask 261120   ;;  %vm282_vm1 = vcmask 7168   ;;  %v921_v1 = vmov -inf   ;;  %v218_v2 = vld [vmem:[%s1170_s1 + $0x10] sm:$0xff]  ;;  %v922_v3 = vmov 0.0  }
  0x17   : > { %777 = vmatpush.xpose.msk.msra.mxu2 %vm220_vm0, %v219_v0  ;;  %283 = vst.msk [vmem:[#allocation3] sm:$0xff] %vm282_vm1, %v921_v1  ;;  %778 = vmatpush.xpose.msk.msra.mxu3 %vm220_vm0, %v219_v0  ;;  %v217_v4 = vld [vmem:[%s1170_s1 + $0x8] sm:$0xff]  ;;  %v216_v5 = vld [vmem:[%s1170_s1] sm:$0xff]  ;;  %v214_v6 = vld [vmem:[%s981_s24 + $0x10] sm:$0xff] }
  0x18   : > { %284 = vst.msk [vmem:[#allocation3 + $0x8] sm:$0xff] %vm282_vm1, %v921_v1  ;;  %751 = vmatpush.xpose.msk.msra.mxu0 %vm220_vm0, %v219_v0  ;;  %776 = vmatpush.xpose.msk.msra.mxu1 %vm220_vm0, %v219_v0  ;;  %v215_v7 = vld [vmem:[%s981_s24 + $0x18] sm:$0xff]  ;;  %v212_v8 = vld [vmem:[%s981_s24] sm:$0xff]  ;;  %v213_v9 = vld [vmem:[%s981_s24 + $0x8] sm:$0xff] }
  0x19   : > { %285 = vst.msk [vmem:[#allocation3 + $0x10] sm:$0xff] %vm282_vm1, %v921_v1 }
  0x1a   : > { %286 = vst.msk [vmem:[#allocation3 + $0x18] sm:$0xff] %vm282_vm1, %v921_v1 }
  0x1b   : > { %287 = vst.msk [vmem:[#allocation4] sm:$0xff] %vm282_vm1, %v922_v3  ;;  %780 = vmatpush.xpose.msk.msra.mxu2 %vm220_vm0, %v218_v2  ;;  %781 = vmatpush.xpose.msk.msra.mxu3 %vm220_vm0, %v218_v2 }
  0x1c   : > { %288 = vst.msk [vmem:[#allocation4 + $0x8] sm:$0xff] %vm282_vm1, %v922_v3  ;;  %752 = vmatpush.xpose.msk.msra.mxu0 %vm220_vm0, %v218_v2  ;;  %779 = vmatpush.xpose.msk.msra.mxu1 %vm220_vm0, %v218_v2 }
  0x1d   : > { %289 = vst.msk [vmem:[#allocation4 + $0x10] sm:$0xff] %vm282_vm1, %v922_v3 }
  0x1e   : > { %290 = vst.msk [vmem:[#allocation4 + $0x18] sm:$0xff] %vm282_vm1, %v922_v3 }
  0x1f   : > { %291 = vst.msk [vmem:[#allocation5] sm:$0xff] %vm220_vm0, %v922_v3  ;;  %783 = vmatpush.xpose.msk.msra.mxu2 %vm220_vm0, %v217_v4  ;;  %784 = vmatpush.xpose.msk.msra.mxu3 %vm220_vm0, %v217_v4 }
  0x20   : > { %292 = vst.msk [vmem:[#allocation5 + $0x8] sm:$0xff] %vm220_vm0, %v922_v3  ;;  %753 = vmatpush.xpose.msk.msra.mxu0 %vm220_vm0, %v217_v4  ;;  %782 = vmatpush.xpose.msk.msra.mxu1 %vm220_vm0, %v217_v4 }
  0x21   : > { %293 = vst.msk [vmem:[#allocation5 + $0x10] sm:$0xff] %vm220_vm0, %v922_v3 }
  0x22   : > { %294 = vst.msk [vmem:[#allocation5 + $0x18] sm:$0xff] %vm220_vm0, %v922_v3 }
  0x23   : > { %786 = vmatpush.xpose.msk.msra.mxu2 %vm220_vm0, %v216_v5  ;;  %787 = vmatpush.xpose.msk.msra.mxu3 %vm220_vm0, %v216_v5 }
  0x24   : > { %754 = vmatpush.xpose.msk.msra.mxu0 %vm220_vm0, %v216_v5  ;;  %785 = vmatpush.xpose.msk.msra.mxu1 %vm220_vm0, %v216_v5 }
  0x26   : > { %757 = vmatmul.msk.f32.vlgmr.msra.gmra.mxu2 %vm220_vm0, %v214_v6  ;;  %758 = vmatmul.msk.f32.vlgmr.msra.gmra.mxu3 %vm220_vm0, %v215_v7 }
  0x27   : > { %755 = vmatmul.msk.f32.vlgmr.msra.gmra.mxu0 %vm220_vm0, %v212_v8  ;;  %756 = vmatmul.msk.f32.vlgmr.msra.gmra.mxu1 %vm220_vm0, %v213_v9 }
  0xa4   : > { %v262_v10 = vpop.f32.mrf.mxu0  ;;  %v265_v11 = vpop.f32.mrf.mxu1 }
  0xa5   : > { %v274_v12 = vmul.f32 0.03125, %v262_v10  ;;  %v275_v13 = vmul.f32 0.03125, %v265_v11 }
  0xa7   : > { %278 = vst.msk [vmem:[#allocation2] sm:$0xff] %vm220_vm0, %v274_v12 }
  0xa8   : > { %279 = vst.msk [vmem:[#allocation2 + $0x8] sm:$0xff] %vm220_vm0, %v275_v13 }
  0xa9   : > { %v268_v14 = vpop.f32.mrf.mxu2  ;;  %v271_v15 = vpop.f32.mrf.mxu3 }
  0xaa   : > { %v276_v16 = vmul.f32 0.03125, %v268_v14  ;;  %v277_v17 = vmul.f32 0.03125, %v271_v15 }
  0xac   : > { %280 = vst.msk [vmem:[#allocation2 + $0x10] sm:$0xff] %vm220_vm0, %v276_v16 }
  0xad   : > { %281 = vst.msk [vmem:[#allocation2 + $0x18] sm:$0xff] %vm220_vm0, %v277_v17 }
  0xae PF: > { %v304_v18 = vld [vmem:[%s986_s28 + $0x28] sm:$0xff]  ;;  %vm305_vm2 = vcmask 261120   ;;  %v303_v19 = vld [vmem:[%s986_s28 + $0x20] sm:$0xff]  ;;  %v302_v20 = vld [vmem:[%s986_s28 + $0x18] sm:$0xff]  ;;  %vm369_vm3 = vcmask 392192   ;;  %v923_v36 = vmov 0  }
  0xaf   : > { %759 = vmatpush.xpose.msk.msra.mxu0 %vm305_vm2, %v304_v18  ;;  %789 = vmatpush.xpose.msk.msra.mxu3 %vm305_vm2, %v304_v18  ;;  %v301_v21 = vld [vmem:[%s986_s28 + $0x10] sm:$0xff]  ;;  %v300_v22 = vld [vmem:[%s986_s28 + $0x8] sm:$0xff]  ;;  %v299_v23 = vld [vmem:[%s986_s28] sm:$0xff]  ;;  %vm454_vm4 = vcmask 7168   ;;  %p773_p8 = scmp.ne.s32.totalorder %s903_s12, 2 }
  0xb0   : > { %788 = vmatpush.xpose.msk.msra.mxu2 %vm305_vm2, %v304_v18  ;;  %509 = vmatpush.msra.mxu1 %v304_v18  ;;  %v295_v24 = vld [vmem:[#allocation2] sm:$0xff]  ;;  %v296_v26 = vld [vmem:[#allocation2 + $0x8] sm:$0xff]  ;;  %v367_v40 = vld [vmem:[#allocation3 + $0x10] sm:$0xff] }
  0xb1   : > { %844 = vset.pattern.permute.xlu2 %v923_v36  ;;  %845 = vset.pattern.permute.xlu0 %v923_v36  ;;  %v365_v37 = vld [vmem:[#allocation3] sm:$0xff]  ;;  %v366_v42 = vld [vmem:[#allocation3 + $0x8] sm:$0xff]  ;;  %v368_v50 = vld [vmem:[#allocation3 + $0x18] sm:$0xff] }
  0xb2   : > { %510 = vmatpush.msra.mxu1 %v303_v19  ;;  %846 = vset.pattern.permute.xlu1 %v923_v36  ;;  %v430_v17 = vld [vmem:[#allocation4] sm:$0xff]  ;;  %v432_v36 = vld [vmem:[#allocation4 + $0x10] sm:$0xff] }
  0xb3   : > { %760 = vmatpush.xpose.msk.msra.mxu0 %vm305_vm2, %v303_v19  ;;  %791 = vmatpush.xpose.msk.msra.mxu3 %vm305_vm2, %v303_v19  ;;  %v297_v25 = vld [vmem:[#allocation2 + $0x10] sm:$0xff] }
  0xb4   : > { %790 = vmatpush.xpose.msk.msra.mxu2 %vm305_vm2, %v303_v19  ;;  %511 = vmatpush.msra.mxu1 %v302_v20  ;;  %v298_v27 = vld [vmem:[#allocation2 + $0x18] sm:$0xff] }
  0xb6   : > { %512 = vmatpush.msra.mxu1 %v301_v21 }
  0xb7   : > { %761 = vmatpush.xpose.msk.msra.mxu0 %vm305_vm2, %v302_v20  ;;  %793 = vmatpush.xpose.msk.msra.mxu3 %vm305_vm2, %v302_v20 }
  0xb8   : > { %792 = vmatpush.xpose.msk.msra.mxu2 %vm305_vm2, %v302_v20  ;;  %513 = vmatpush.msra.mxu1 %v300_v22 }
  0xba   : > { %514 = vmatpush.msra.mxu1 %v299_v23 }
  0xbb   : > { %762 = vmatpush.xpose.msk.msra.mxu0 %vm305_vm2, %v301_v21  ;;  %795 = vmatpush.xpose.msk.msra.mxu3 %vm305_vm2, %v301_v21 }
  0xbc   : > { %794 = vmatpush.xpose.msk.msra.mxu2 %vm305_vm2, %v301_v21 }
  0xbf   : > { %763 = vmatpush.xpose.msk.msra.mxu0 %vm305_vm2, %v300_v22  ;;  %797 = vmatpush.xpose.msk.msra.mxu3 %vm305_vm2, %v300_v22 }
  0xc0   : > { %796 = vmatpush.xpose.msk.msra.mxu2 %vm305_vm2, %v300_v22  ;;  %v431_v22 = vld [vmem:[#allocation4 + $0x8] sm:$0xff] }
  0xc3   : > { %764 = vmatpush.xpose.msk.msra.mxu0 %vm305_vm2, %v299_v23  ;;  %799 = vmatpush.xpose.msk.msra.mxu3 %vm305_vm2, %v299_v23 }
  0xc4   : > { %798 = vmatpush.xpose.msk.msra.mxu2 %vm305_vm2, %v299_v23  ;;  %v459_v23 = vld [vmem:[#allocation5] sm:$0xff] }
  0xc6   : > { %765 = vmatmul.msk.f32.vlgmr.msra.gmra.mxu0 %vm305_vm2, %v295_v24  ;;  %767 = vmatmul.msk.f32.vlgmr.msra.gmra.mxu3 %vm305_vm2, %v297_v25 }
  0xc7   : > { %766 = vmatmul.msk.f32.vlgmr.msra.gmra.mxu2 %vm305_vm2, %v296_v26 }
  0xce   : > { %768 = vmatmul.msk.f32.gmra.mxu3 %vm305_vm2, %v298_v27 }
 0x143   : > { %v353_v28 = vpop.f32.mrf.mxu0 }
 0x144   : > { %v370_v29 = vsel %vm369_vm3, %v353_v28, -inf }
 0x145   : > { %371 = vmax.xlane.f32.xlu0 %v370_v29 }
 0x149   : > { %v1075_v30 = vpop.f32.mrf.mxu3 }
 0x14a   : > { %v376_v31 = vsel %vm369_vm3, %v1075_v30, -inf  ;;  %v356_v32 = vpop.f32.mrf.mxu2 }
 0x14b   : > { %377 = vmax.xlane.f32.xlu1 %v376_v31  ;;  %v373_v33 = vsel %vm369_vm3, %v356_v32, -inf }
 0x14d   : > { %374 = vmax.xlane.f32.xlu0 %v373_v33 }
 0x151   : > { %v1080_v34 = vpop.f32.mrf.mxu3 }
 0x152   : > { %v379_v35 = vsel %vm369_vm3, %v1080_v34, -inf }
 0x153   : > { %380 = vmax.xlane.f32.xlu1 %v379_v35 }
 0x1b8   : > { %v372_v38 = vpop.xlane.xlu0 %371 }
 0x1b9   : > { %v382_v39 = vmax.f32 %v365_v37, %v372_v38 }
 0x1bb   : > { %536 = vst.msk [vmem:[#allocation3] sm:$0xff] %vm454_vm4, %v382_v39  ;;  %400 = vperm.xlu2 %844, %v382_v39   ;;  %v386_v44 = vsub.f32 %v365_v37, %v382_v39 }
 0x1bd   : > { %v390_v49 = vmul.f32 1.442695, %v386_v44 }
 0x1be   : > { %v378_v41 = vpop.xlane.xlu1 %377 }
 0x1bf   : > { %v384_v43 = vmax.f32 %v367_v40, %v378_v41  ;;  %v433_v41 = vld [vmem:[#allocation4 + $0x18] sm:$0xff] }
 0x1c0   : > { %v375_v45 = vpop.xlane.xlu0 %374 }
 0x1c1   : > { %v388_v46 = vsub.f32 %v367_v40, %v384_v43  ;;  %538 = vst.msk [vmem:[#allocation3 + $0x10] sm:$0xff] %vm454_vm4, %v384_v43  ;;  %v383_v47 = vmax.f32 %v366_v42, %v375_v45  ;;  %410 = vperm.xlu0 %845, %v384_v43  }
 0x1c3   : > { %v394_v48 = vmul.f32 1.442695, %v388_v46  ;;  %537 = vst.msk [vmem:[#allocation3 + $0x8] sm:$0xff] %vm454_vm4, %v383_v47  ;;  %405 = vperm.xlu2 %844, %v383_v47   ;;  %v387_v53 = vsub.f32 %v366_v42, %v383_v47  ;;  %v461_v42 = vld [vmem:[#allocation5 + $0x10] sm:$0xff] }
 0x1c5   : > { %847 = vpow2.f32 %v394_v48  ;;  %v392_v55 = vmul.f32 1.442695, %v387_v53 }
 0x1c6   : > { %v381_v51 = vpop.xlane.xlu1 %380  ;;  %849 = vpow2.f32 %v390_v49  ;;  %v462_v49 = vld [vmem:[#allocation5 + $0x18] sm:$0xff] }
 0x1c7   : > { %v385_v52 = vmax.f32 %v368_v50, %v381_v51  ;;  %851 = vpow2.f32 %v392_v55 }
 0x1c9   : > { %539 = vst.msk [vmem:[#allocation3 + $0x18] sm:$0xff] %vm454_vm4, %v385_v52  ;;  %415 = vperm.xlu1 %846, %v385_v52   ;;  %v389_v57 = vsub.f32 %v368_v50, %v385_v52 }
 0x1cb   : > { %v1088_v54 = vpop.eup %847  ;;  %v396_v59 = vmul.f32 1.442695, %v389_v57 }
 0x1cc   : > { %475 = vperm.xlu0 %845, %v1088_v54   ;;  %v850_v56 = vpop.eup %849  ;;  %v436_v37 = vmul.f32 %v1088_v54, %v432_v36 }
 0x1cd   : > { %v852_v58 = vpop.eup %851  ;;  %853 = vpow2.f32 %v396_v59  ;;  %v434_v18 = vmul.f32 %v850_v56, %v430_v17 }
 0x1ce   : > { %v435_v24 = vmul.f32 %v852_v58, %v431_v22 }
 0x1d1   : > { %465 = vperm.xlu1 %846, %v850_v56  }
 0x1d3   : > { %v1091_v60 = vpop.eup %853 }
 0x1d4   : > { %v437_v43 = vmul.f32 %v1091_v60, %v433_v41 }
 0x1d9   : > { %470 = vperm.xlu1 %846, %v852_v58  }
 0x1e1   : > { %480 = vperm.xlu1 %846, %v1091_v60  }
 0x215   : > { %v401_v61 = vpop.permute.xlu2 %400 }
 0x216   : > { %v418_v62 = vsub.f32 %v353_v28, %v401_v61 }
 0x218   : > { %v422_v63 = vmul.f32 1.442695, %v418_v62 }
 0x21a   : > { %855 = vpow2.f32 %v422_v63 }
 0x21d   : > { %v406_v0 = vpop.permute.xlu2 %405 }
 0x21e   : > { %v419_v1 = vsub.f32 %v356_v32, %v406_v0 }
 0x220   : > { %v856_v2 = vpop.eup %855  ;;  %v424_v3 = vmul.f32 1.442695, %v419_v1 }
 0x221   : > { %769 = vmatmul.msk.f32.vlgmr.msra.gmra.mxu1 %vm369_vm3, %v856_v2  ;;  %v438_v4 = vsel %vm369_vm3, %v856_v2, 0.0 }
 0x222   : > { %857 = vpow2.f32 %v424_v3  ;;  %439 = vadd.xlane.f32.xlu2 %v438_v4 }
 0x228   : > { %v858_v5 = vpop.eup %857 }
 0x229   : > { %770 = vmatmul.msk.f32.gmra.mxu1 %vm369_vm3, %v858_v5  ;;  %v441_v6 = vsel %vm369_vm3, %v858_v5, 0.0 }
 0x22a   : > { %442 = vadd.xlane.f32.xlu2 %v441_v6 }
 0x233   : > { %v411_v7 = vpop.permute.xlu0 %410 }
 0x234   : > { %v420_v8 = vsub.f32 %v1075_v30, %v411_v7  ;;  %v460_v30 = vld [vmem:[#allocation5 + $0x8] sm:$0xff] }
 0x236   : > { %v426_v9 = vmul.f32 1.442695, %v420_v8 }
 0x238   : > { %859 = vpow2.f32 %v426_v9 }
 0x23b   : > { %v416_v10 = vpop.permute.xlu1 %415 }
 0x23c   : > { %v421_v11 = vsub.f32 %v1080_v34, %v416_v10 }
 0x23e   : > { %v860_v12 = vpop.eup %859  ;;  %v428_v13 = vmul.f32 1.442695, %v421_v11  ;;  %v476_v35 = vpop.permute.xlu0 %475 }
 0x23f   : > { %771 = vmatmul.msk.f32.gmra.mxu1 %vm369_vm3, %v860_v12  ;;  %v444_v14 = vsel %vm369_vm3, %v860_v12, 0.0  ;;  %v485_v44 = vmul.f32 %v476_v35, %v461_v42 }
 0x240   : > { %861 = vpow2.f32 %v428_v13  ;;  %445 = vadd.xlane.f32.xlu0 %v444_v14 }
 0x243   : > { %v466_v21 = vpop.permute.xlu1 %465 }
 0x244   : > { %v483_v25 = vmul.f32 %v466_v21, %v459_v23 }
 0x246   : > { %v862_v15 = vpop.eup %861 }
 0x247   : > { %772 = vmatmul.msk.f32.gmra.mxu1 %vm369_vm3, %v862_v15  ;;  %v447_v16 = vsel %vm369_vm3, %v862_v15, 0.0 }
 0x248   : > { %448 = vadd.xlane.f32.xlu1 %v447_v16 }
 0x24b   : > { %v471_v31 = vpop.permute.xlu1 %470 }
 0x24c   : > { %v484_v32 = vmul.f32 %v471_v31, %v460_v30 }
 0x253   : > { %v481_v38 = vpop.permute.xlu1 %480 }
 0x254   : > { %v486_v50 = vmul.f32 %v481_v38, %v462_v49 }
 0x295   : > { %v440_v19 = vpop.xlane.xlu2 %439 }
 0x296   : > { %v450_v20 = vadd.f32 %v440_v19, %v434_v18 }
 0x298   : > { %455 = vst.msk [vmem:[#allocation4] sm:$0xff] %vm454_vm4, %v450_v20 }
 0x29d   : > { %v443_v26 = vpop.xlane.xlu2 %442 }
 0x29e   : > { %v451_v27 = vadd.f32 %v443_v26, %v435_v24  ;;  %v516_v28 = vpop.f32.mrf.mxu1 }
 0x29f   : > { %v528_v29 = vadd.f32 %v516_v28, %v483_v25 }
 0x2a0   : > { %456 = vst.msk [vmem:[#allocation4 + $0x8] sm:$0xff] %vm454_vm4, %v451_v27 }
 0x2a1   : > { %532 = vst.msk [vmem:[#allocation5] sm:$0xff] %vm305_vm2, %v528_v29 }
 0x2a6   : > { %v519_v33 = vpop.f32.mrf.mxu1 }
 0x2a7   : > { %v529_v34 = vadd.f32 %v519_v33, %v484_v32 }
 0x2a9   : > { %533 = vst.msk [vmem:[#allocation5 + $0x8] sm:$0xff] %vm305_vm2, %v529_v34 }
 0x2b3   : > { %v446_v39 = vpop.xlane.xlu0 %445 }
 0x2b4   : > { %v452_v40 = vadd.f32 %v446_v39, %v436_v37 }
 0x2b6   : > { %457 = vst.msk [vmem:[#allocation4 + $0x10] sm:$0xff] %vm454_vm4, %v452_v40 }
 0x2bb   : > { %v449_v45 = vpop.xlane.xlu1 %448 }
 0x2bc   : > { %v453_v46 = vadd.f32 %v449_v45, %v437_v43  ;;  %v522_v47 = vpop.f32.mrf.mxu1 }
 0x2bd   : > { %v530_v48 = vadd.f32 %v522_v47, %v485_v44 }
 0x2be   : > { %458 = vst.msk [vmem:[#allocation4 + $0x18] sm:$0xff] %vm454_vm4, %v453_v46 }
 0x2bf   : > { %534 = vst.msk [vmem:[#allocation5 + $0x10] sm:$0xff] %vm305_vm2, %v530_v48 }
 0x2c3   : > { %543 = sbr.rel (%p773_p8) target bundleno = 872 (0x368), region = 40 }
 0x2c4   : > { %v525_v51 = vpop.f32.mrf.mxu1 }
 0x2c5   : > { %v531_v52 = vadd.f32 %v525_v51, %v486_v50 }
 0x2c7   : > { %535 = vst.msk [vmem:[#allocation5 + $0x18] sm:$0xff] %vm305_vm2, %v531_v52 }
 0x2c8   : > { %v550_v53 = vld [vmem:[#allocation3 + $0x10] sm:$0xff]  ;;  %v924_v54 = vmov 0   ;;  %v548_v56 = vld [vmem:[#allocation3] sm:$0xff]  ;;  %v551_v57 = vld [vmem:[#allocation3 + $0x18] sm:$0xff] }
 0x2c9   : > { %864 = vset.pattern.permute.xlu1 %v924_v54  ;;  %863 = vset.pattern.permute.xlu0 %v924_v54  ;;  %v554_v55 = vsub.f32 0.0, %v550_v53  ;;  %v552_v58 = vsub.f32 0.0, %v548_v56  ;;  %v555_v59 = vsub.f32 0.0, %v551_v57  ;;  %v549_v60 = vld [vmem:[#allocation3 + $0x8] sm:$0xff]  ;;  %v546_v3 = vld [vmem:[#allocation4 + $0x10] sm:$0xff]  ;;  %v544_v6 = vld [vmem:[#allocation4] sm:$0xff] }
 0x2ca   : > { %v553_v62 = vsub.f32 0.0, %v549_v60  ;;  %v547_v13 = vld [vmem:[#allocation4 + $0x18] sm:$0xff]  ;;  %v545_v14 = vld [vmem:[#allocation4 + $0x8] sm:$0xff] }
 0x2cb   : > { %v560_v61 = vmul.f32 1.442695, %v554_v55  ;;  %v556_v63 = vmul.f32 1.442695, %v552_v58  ;;  %v562_v0 = vmul.f32 1.442695, %v555_v59 }
 0x2cc   : > { %v558_v1 = vmul.f32 1.442695, %v553_v62 }
 0x2cd   : > { %865 = vpow2.f32 %v560_v61 }
 0x2ce   : > { %867 = vpow2.f32 %v556_v63  ;;  %v628_v63 = vld [vmem:[#allocation5] sm:$0xff] }
 0x2cf   : > { %869 = vpow2.f32 %v562_v0 }
 0x2d0   : > { %871 = vpow2.f32 %v558_v1 }
 0x2d3   : > { %v866_v2 = vpop.eup %865 }
 0x2d4   : > { %v868_v4 = vpop.eup %867  ;;  %v566_v5 = vmul.f32 16.0, %v866_v2 }
 0x2d5   : > { %v870_v7 = vpop.eup %869  ;;  %v564_v8 = vmul.f32 16.0, %v868_v4  ;;  %v630_v4 = vld [vmem:[#allocation5 + $0x10] sm:$0xff] }
 0x2d6   : > { %v872_v9 = vpop.eup %871  ;;  %v570_v10 = vsub.f32 %v546_v3, %v566_v5  ;;  %v567_v11 = vmul.f32 16.0, %v870_v7  ;;  %v629_v3 = vld [vmem:[#allocation5 + $0x8] sm:$0xff]  ;;  %v631_v5 = vld [vmem:[#allocation5 + $0x18] sm:$0xff] }
 0x2d7   : > { %v568_v12 = vsub.f32 %v544_v6, %v564_v8  ;;  %v565_v15 = vmul.f32 16.0, %v872_v9 }
 0x2d8   : > { %873 = vrcp.f32 %v570_v10  ;;  %v571_v16 = vsub.f32 %v547_v13, %v567_v11  ;;  %v609_v19 = vand.u32 2147483647, %v570_v10  ;;  %v611_v22 = vand.u32 2147483648, %v570_v10 }
 0x2d9   : > { %875 = vrcp.f32 %v568_v12  ;;  %v569_v17 = vsub.f32 %v545_v14, %v565_v15  ;;  %v581_v23 = vand.u32 2147483647, %v568_v12  ;;  %v583_v25 = vand.u32 2147483648, %v568_v12 }
 0x2da   : > { %877 = vrcp.f32 %v571_v16  ;;  %vm605_vm5 = vweird.f32 %v570_v10  ;;  %vm1115_vm7 = vcmp.eq.f32.partialorder %v609_v19, 8.507059e+37  ;;  %vm577_vm8 = vweird.f32 %v568_v12 }
 0x2db   : > { %879 = vrcp.f32 %v569_v17  ;;  %v612_v32 = vor.u32 1.1754944e-38, %v611_v22  ;;  %vm1119_vm10 = vcmp.eq.f32.partialorder %v581_v23, 8.507059e+37  ;;  %v584_v37 = vor.u32 1.1754944e-38, %v583_v25 }
 0x2dc   : > { %vm619_vm12 = vweird.f32 %v571_v16  ;;  %v625_v42 = vand.u32 2147483648, %v571_v16  ;;  %vm591_vm15 = vweird.f32 %v569_v17  ;;  %v623_v47 = vand.u32 2147483647, %v571_v16 }
 0x2dd   : > { %v597_v48 = vand.u32 2147483648, %v569_v17  ;;  %v595_v53 = vand.u32 2147483647, %v569_v17 }
 0x2de   : > { %v874_v18 = vpop.eup %873  ;;  %v626_v56 = vor.u32 1.1754944e-38, %v625_v42  ;;  %vm624_vm4 = vcmp.eq.f32.partialorder %v623_v47, 8.507059e+37 }
 0x2df   : > { %v876_v20 = vpop.eup %875  ;;  %v601_v21 = vmul.f32 %v874_v18, %v570_v10  ;;  %vm606_vm6 = vweird.f32 %v874_v18  ;;  %v598_v59 = vor.u32 1.1754944e-38, %v597_v48 }
 0x2e0   : > { %v573_v24 = vmul.f32 %v876_v20, %v568_v12  ;;  %v878_v27 = vpop.eup %877  ;;  %vm578_vm9 = vweird.f32 %v876_v20  ;;  %vm1123_vm11 = vmor %vm605_vm5, %vm606_vm6  ;;  %vm596_vm5 = vcmp.eq.f32.partialorder %v595_v53, 8.507059e+37 }
 0x2e1   : > { %v602_v26 = vsub.f32 1.0, %v601_v21  ;;  %v880_v30 = vpop.eup %879  ;;  %v615_v34 = vmul.f32 %v878_v27, %v571_v16  ;;  %vm1127_vm13 = vmor %vm577_vm8, %vm578_vm9  ;;  %vm620_vm14 = vweird.f32 %v878_v27 }
 0x2e2   : > { %v574_v29 = vsub.f32 1.0, %v573_v24  ;;  %v587_v38 = vmul.f32 %v880_v30, %v569_v17  ;;  %vm592_vm0 = vweird.f32 %v880_v30  ;;  %vm1138_vm1 = vmor %vm619_vm12, %vm620_vm14 }
 0x2e3   : > { %v603_v31 = vmul.f32 %v874_v18, %v602_v26  ;;  %v616_v41 = vsub.f32 1.0, %v615_v34  ;;  %vm593_vm3 = vmor %vm591_vm15, %vm592_vm0 }
 0x2e4   : > { %v575_v36 = vmul.f32 %v876_v20, %v574_v29  ;;  %v588_v44 = vsub.f32 1.0, %v587_v38 }
 0x2e5   : > { %v604_v39 = vadd.f32 %v874_v18, %v603_v31  ;;  %v617_v46 = vmul.f32 %v878_v27, %v616_v41 }
 0x2e6   : > { %v576_v43 = vadd.f32 %v876_v20, %v575_v36  ;;  %v589_v52 = vmul.f32 %v880_v30, %v588_v44 }
 0x2e7   : > { %v608_v45 = vsel %vm1123_vm11, %v874_v18, %v604_v39  ;;  %v618_v55 = vadd.f32 %v878_v27, %v617_v46 }
 0x2e8   : > { %v613_v49 = vsel %vm1115_vm7, %v612_v32, %v608_v45  ;;  %v580_v50 = vsel %vm1127_vm13, %v876_v20, %v576_v43  ;;  %v590_v57 = vadd.f32 %v880_v30, %v589_v52 }
 0x2e9   : > { %644 = vperm.xlu1 %864, %v613_v49   ;;  %v585_v54 = vsel %vm1119_vm10, %v584_v37, %v580_v50  ;;  %v622_v58 = vsel %vm1138_vm1, %v878_v27, %v618_v55 }
 0x2ea   : > { %634 = vperm.xlu0 %863, %v585_v54   ;;  %v594_v60 = vsel %vm593_vm3, %v880_v30, %v590_v57  ;;  %v627_v61 = vsel %vm624_vm4, %v626_v56, %v622_v58 }
 0x2eb   : > { %v599_v62 = vsel %vm596_vm5, %v598_v59, %v594_v60 }
 0x2f1   : > { %649 = vperm.xlu1 %864, %v627_v61  }
 0x2f2   : > { %639 = vperm.xlu0 %863, %v599_v62  }
 0x35b   : > { %v645_v0 = vpop.permute.xlu1 %644 }
 0x35c   : > { %v635_v1 = vpop.permute.xlu0 %634  ;;  %v654_v9 = vmul.f32 %v645_v0, %v630_v4 }
 0x35d   : > { %v652_v2 = vmul.f32 %v635_v1, %v628_v63 }
 0x35e   : > { %658 = vst.msk [vmem:[%s991_s4 + $0x10] sm:$0xff] %vm305_vm2, %v654_v9 }
 0x35f   : > { %656 = vst.msk [vmem:[%s991_s4] sm:$0xff] %vm305_vm2, %v652_v2 }
 0x363   : > { %v650_v6 = vpop.permute.xlu1 %649 }
 0x364   : > { %v640_v7 = vpop.permute.xlu0 %639  ;;  %v655_v10 = vmul.f32 %v650_v6, %v631_v5 }
 0x365   : > { %v653_v8 = vmul.f32 %v640_v7, %v629_v3 }
 0x366   : > { %659 = vst.msk [vmem:[%s991_s4 + $0x18] sm:$0xff] %vm305_vm2, %v655_v10 }
 0x367   : > { %657 = vst.msk [vmem:[%s991_s4 + $0x8] sm:$0xff] %vm305_vm2, %v653_v8 }
 0x368 PF: > { %s13_s16 = sadd.s32 1, %s919_s16   ;;  %s1183_s12 = smov %s911_s14 }
 0x369   : > { %p10_p9 = scmp.ge.s32.totalorder %s13_s16, 8   ;;  %s1184_s13 = smov %s915_s15 }
 0x36a   : > { %s1185_s14 = smov %s1188_s17  ;;  %s1186_s15 = smov %s1192_s18 }
 0x36b   :  { %12 = sbr.rel (!%p10_p9) target bundleno = 3 (0x3), region = 73 }

</bundles_post_ra>
